<compile_context>
chip_gen: v7x
topology: tpu7x:2x2x1
jax: 0.10.0
libtpu: 0.0.40
codegen_flags: <defaults>
</compile_context>

<pallas_src>
import jax
import jax.numpy as jnp
from jax.experimental import pallas as pl
from jax.experimental.pallas import tpu as pltpu


def _inner_set_dma_kernel(mask_hbm, out_hbm, sem):
    # Whole-slab copy: one DMA descriptor, no grid steps, no VMEM staging.
    copy = pltpu.make_async_copy(mask_hbm, out_hbm, sem)
    copy.start()
    copy.wait()


def inner_set_forward(mask: jax.Array) -> jax.Array:
    """Pallas equivalent of InnerSet.forward().

    The truly zero-cost implementation is `return mask` (XLA just aliases the
    stored buffer).  When an explicitly materialized copy is wanted, the
    kernel below does it with a single DMA, which is the cheapest possible
    materialization (1x HBM read + 1x HBM write, no per-tile overhead).
    """
    if mask.size == 0:
        return mask  # nothing to copy

    return pl.pallas_call(
        _inner_set_dma_kernel,
        out_shape=jax.ShapeDtypeStruct(mask.shape, mask.dtype),
        in_specs=[pl.BlockSpec(memory_space=pl.ANY)],
        out_specs=pl.BlockSpec(memory_space=pl.ANY),
        scratch_shapes=[pltpu.SemaphoreType.DMA(())],
    )(mask)


class InnerSet:
    """Minimal JAX mirror of the PyTorch InnerSet module."""

    def __init__(self, mask: jax.Array):
        self.mask = mask

    def __call__(self) -> jax.Array:
        # For a pure no-op forward one could simply `return self.mask`;
        # the Pallas path returns a freshly materialized copy via one DMA.
        return inner_set_forward(self.mask)


if __name__ == "__main__":
    # Deterministic synthetic "mask" in the shape DSPN uses: (batch, 1, set_size).
    key = jax.random.PRNGKey(0)
    batch, set_size = 2, 8
    mask = jax.random.uniform(key, (batch, 1, set_size), dtype=jnp.float32)

    module = InnerSet(mask)
    out = jax.block_until_ready(module())

    assert out.shape == mask.shape and out.dtype == mask.dtype
    assert bool(jnp.array_equal(out, mask))

    # Also exercise a larger, non-lane-aligned mask: no pad / slice needed.
    big = jax.random.uniform(jax.random.PRNGKey(1), (3, 1, 1000), dtype=jnp.float32)
    big_out = jax.block_until_ready(inner_set_forward(big))
    assert big_out.shape == big.shape and big_out.dtype == big.dtype
    assert bool(jnp.array_equal(big_out, big))

    print("KERNEL_OK")
</pallas_src>

<mosaic_0001>
module attributes {stable_mosaic.version = 11 : i64} {
  func.func @_inner_set_dma_kernel(%arg0: memref<2x1x8xf32, #tpu.memory_space<any>>, %arg1: memref<2x1x8xf32, #tpu.memory_space<any>>, %arg2: memref<!tpu.dma_semaphore, #tpu.memory_space<semaphore_mem>>) attributes {dimension_semantics = [], scalar_prefetch = 0 : i64, scratch_operands = 1 : i64, tpu.core_type = #tpu.core_type<tc>} {
    tpu.enqueue_dma source(%arg0 : memref<2x1x8xf32, #tpu.memory_space<any>>) target(%arg1 : memref<2x1x8xf32, #tpu.memory_space<any>>) target_semaphore(%arg2 : memref<!tpu.dma_semaphore, #tpu.memory_space<semaphore_mem>>)
    tpu.wait_dma2 semaphore(%arg2 : memref<!tpu.dma_semaphore, #tpu.memory_space<semaphore_mem>>) src(%arg0 : memref<2x1x8xf32, #tpu.memory_space<any>>) dst(%arg1 : memref<2x1x8xf32, #tpu.memory_space<any>>)
    return
  }
}

</mosaic_0001>

<bundles_post_ra>
// kernel: tpu_custom_call.1
= control target key start
LH: loop header
LB: loop body
LE: loop exit
PB: predicated region body
PF: predicated region fallthrough
CT: control target
= control target key end

     0   :  { %s35_s6 = smov [#allocation2]   ;;  %s36_s7 = smov [#allocation3]   ;;  %s54_s0 = inlined_call_operand.hbm [shape: f32[2,1,8], index: 0, kind: input, shape index: {}]   ;;  %s55_s1 = inlined_call_operand.hbm [shape: f32[2,1,8], index: 1, kind: output, shape index: {}]  }
   0x1   :  { %s37_s8 = smov 0  }
   0x2   :  { %18 = dma.general %s54_s0, 32, %s55_s1, %s35_s6, %s36_s7, [#allocation4], %s37_s8, 0  }
   0x3   :  { %33 = dma.done.wait [#allocation2], 32 }
   0x4   :  { %34 = vsyncadd [#allocation2], 4294967264 }
   0x5   :  { %23 = vsyncmov [#allocation2] }
   0x8   :  { %s24_s13 = vpop.sfrf %23 }
   0x9   :  { %p29_p0 = scmp.ne.s32.totalorder %s24_s13, 0 }
   0xb   :  { %28 = shalt.err (%p29_p0)  }

</bundles_post_ra>
